<compile_context>
chip_gen: v5e
topology: v5e:2x2
jax: 0.10.0
libtpu: 0.0.40
codegen_flags: <defaults>
</compile_context>

<pallas_src>
import math

import jax
import jax.numpy as jnp
from jax.experimental import pallas as pl
from jax.experimental.pallas import tpu as pltpu


def affine_kernel(alpha_ref, beta_ref, x_ref, o_ref):
    # alpha_ref / beta_ref: (1, Dr) resident constants; x_ref / o_ref: (tm, Dr).
    # out = beta + alpha * x  (torch.addcmul), broadcast over rows.
    o_ref[...] = (x_ref[...] * alpha_ref[...] + beta_ref[...]).astype(o_ref.dtype)


def _vmem_block_budget_bytes() -> int:
    """Per-block byte budget derived from the chip's VMEM capacity."""
    cap = 64 << 20  # conservative fallback (v7x per-TC VMEM)
    try:
        info = pltpu.get_tpu_info()
        cap = int(getattr(info, "vmem_capacity_bytes", cap))
    except Exception:
        pass
    # Keep the pipelined working set (x + out, double-buffered = 4 blocks)
    # within min(VMEM/4, 16 MiB); per-block budget is a quarter of that.
    total = min(cap // 4, 16 << 20)
    return max(total // 4, 64 << 10)


def _pick_row_tile(m: int, row_bytes: int, block_budget_bytes: int) -> int:
    """Multiple-of-8 row tile under the byte budget; ~>=8 grid steps when
    there is enough work (megacore sharding on v7x + pipeline depth)."""
    if m <= 16:
        return m  # full-extent block is always legal; too small to split
    cap = max(8, (block_budget_bytes // max(row_bytes, 1)) // 8 * 8)
    want = max(8, (((m + 7) // 8 + 7) // 8) * 8)  # ~8 tiles, multiple of 8
    return min(cap, want)


def affine(x, alpha, beta):
    """x: (B, N, D); alpha, beta: (1, 1, D) (PyTorch parameter layout)."""
    B, N, D = x.shape
    M = B * N
    dtype = x.dtype
    itemsize = jnp.dtype(dtype).itemsize

    x2 = x.reshape(M, D)                       # row-major flatten; D stays lane dim
    a2 = alpha.reshape(1, D).astype(dtype)     # params follow x's dtype (bf16 path)
    b2 = beta.reshape(1, D).astype(dtype)

    # Lane-densify: if D is not a multiple of 128, fold f consecutive rows into
    # one row of f*D lanes so vregs/stores are full-width. Pure layout plumbing
    # in the wrapper; the kernel body is unchanged.
    f = 1
    if D % 128 != 0:
        cand = 128 // math.gcd(D, 128)
        if cand <= 32 and M % cand == 0:
            f = cand
    Mr, Dr = M // f, f * D
    if f > 1:
        x2 = x2.reshape(Mr, Dr)
        a2 = jnp.tile(a2, (1, f))
        b2 = jnp.tile(b2, (1, f))

    row_bytes = Dr * itemsize
    tm = _pick_row_tile(Mr, row_bytes, _vmem_block_budget_bytes())
    grid = (pl.cdiv(Mr, tm),)                  # ragged last block is masked

    const_spec = pl.BlockSpec((1, Dr), lambda i: (0, 0))   # resident constants
    row_spec = pl.BlockSpec((tm, Dr), lambda i: (i, 0))    # streamed row tiles

    cost = pl.CostEstimate(
        flops=2 * Mr * Dr,
        transcendentals=0,
        bytes_accessed=2 * Mr * Dr * itemsize + 2 * Dr * itemsize,
    )

    out2 = pl.pallas_call(
        affine_kernel,
        out_shape=jax.ShapeDtypeStruct((Mr, Dr), dtype),
        grid=grid,
        in_specs=[const_spec, const_spec, row_spec],
        out_specs=row_spec,
        compiler_params=pltpu.CompilerParams(
            dimension_semantics=("parallel",),
            vmem_limit_bytes=32 * 1024 * 1024,  # 2x headroom over the <=16 MiB
        ),                                      # working set; safe on v5e/v6e/v7x
        cost_estimate=cost,
    )(a2, b2, x2)

    # TODO(synk): for end-to-end wins, fuse this affine into the adjacent
    # Mixer-block kernel (or let XLA fuse it) instead of a standalone pass.
    return out2.reshape(M, D).reshape(B, N, D)


def affine_ref(x, alpha, beta):
    # pure-JAX reference: torch.addcmul(beta, alpha, x)
    return beta + alpha * x


if __name__ == "__main__":
    B, N, D = 2, 8, 32                # batch, tokens, dim
    key = jax.random.PRNGKey(0)
    kx, ka, kb = jax.random.split(key, 3)

    x = jax.random.normal(kx, (B, N, D), jnp.float32)
    # Module default init is alpha=ones, beta=zeros; use random values so the
    # correctness check is non-trivial (forward semantics are identical).
    alpha = 1.0 + 0.1 * jax.random.normal(ka, (1, 1, D), jnp.float32)
    beta = 0.1 * jax.random.normal(kb, (1, 1, D), jnp.float32)

    out = jax.block_until_ready(affine(x, alpha, beta))
    ref = affine_ref(x, alpha, beta)

    assert out.shape == (B, N, D)
    assert out.dtype == x.dtype
    assert jnp.allclose(out, ref, atol=1e-6, rtol=1e-6), \
        f"max err {jnp.max(jnp.abs(out - ref))}"

    print("KERNEL_OK")
</pallas_src>

<mosaic_0001>
module attributes {stable_mosaic.version = 11 : i64} {
  func.func @affine_kernel(%arg0: i32, %arg1: memref<1x128xf32, #tpu.memory_space<vmem>>, %arg2: memref<1x128xf32, #tpu.memory_space<vmem>>, %arg3: memref<4x128xf32, #tpu.memory_space<vmem>>, %arg4: memref<4x128xf32, #tpu.memory_space<vmem>>) attributes {dimension_semantics = [#tpu.dimension_semantics<parallel>], iteration_bounds = array<i64: 1>, scalar_prefetch = 0 : i64, scratch_operands = 0 : i64, tpu.core_type = #tpu.core_type<tc>, window_params = [{pipeline_mode = #tpu.pipeline_mode<synchronous>, transform_indices = @transform_0, window_bounds = array<i64: 1, 128>}, {pipeline_mode = #tpu.pipeline_mode<synchronous>, transform_indices = @transform_1, window_bounds = array<i64: 1, 128>}, {transform_indices = @transform_2, window_bounds = array<i64: 4, 128>}, {transform_indices = @transform_3, window_bounds = array<i64: 4, 128>}]} {
    %c0 = arith.constant 0 : index
    %c0_0 = arith.constant 0 : index
    %0 = vector.load %arg3[%c0, %c0_0] : memref<4x128xf32, #tpu.memory_space<vmem>>, vector<4x128xf32>
    %c0_1 = arith.constant 0 : index
    %c0_2 = arith.constant 0 : index
    %1 = vector.load %arg1[%c0_1, %c0_2] : memref<1x128xf32, #tpu.memory_space<vmem>>, vector<1x128xf32>
    %2 = vector.broadcast %1 : vector<1x128xf32> to vector<4x128xf32>
    %3 = arith.mulf %0, %2 : vector<4x128xf32>
    %c0_3 = arith.constant 0 : index
    %c0_4 = arith.constant 0 : index
    %4 = vector.load %arg2[%c0_3, %c0_4] : memref<1x128xf32, #tpu.memory_space<vmem>>, vector<1x128xf32>
    %5 = vector.broadcast %4 : vector<1x128xf32> to vector<4x128xf32>
    %6 = arith.addf %3, %5 : vector<4x128xf32>
    %c0_5 = arith.constant 0 : index
    %c0_6 = arith.constant 0 : index
    %7 = vector.load %arg4[%c0_5, %c0_6] : memref<4x128xf32, #tpu.memory_space<vmem>>, vector<4x128xf32>
    tpu.vector_store %arg4[%c0_5, %c0_6], %6 {strides = array<i32>} : memref<4x128xf32, #tpu.memory_space<vmem>>, vector<4x128xf32>,
    return
  }
  func.func @transform_0(%arg0: i32) -> (i32, i32) {
    %c0_i32 = arith.constant 0 : i32
    %c0_i32_0 = arith.constant 0 : i32
    %c0_i32_1 = arith.constant 0 : i32
    return %c0_i32, %c0_i32_0 : i32, i32
  }
  func.func @transform_1(%arg0: i32) -> (i32, i32) {
    %c0_i32 = arith.constant 0 : i32
    %c0_i32_0 = arith.constant 0 : i32
    %c0_i32_1 = arith.constant 0 : i32
    return %c0_i32, %c0_i32_0 : i32, i32
  }
  func.func @transform_2(%arg0: i32) -> (i32, i32) {
    %c0_i32 = arith.constant 0 : i32
    %c0_i32_0 = arith.constant 0 : i32
    return %arg0, %c0_i32 : i32, i32
  }
  func.func @transform_3(%arg0: i32) -> (i32, i32) {
    %c0_i32 = arith.constant 0 : i32
    %c0_i32_0 = arith.constant 0 : i32
    return %arg0, %c0_i32 : i32, i32
  }
}

</mosaic_0001>

<bundles_post_ra>
// kernel: tpu_custom_call.1
= control target key start
LH: loop header
LB: loop body
LE: loop exit
PB: predicated region body
PF: predicated region fallthrough
CT: control target
= control target key end

     0   :  { %8 = vsyncpa [#allocation3], 0  ;;  %s230_s0 = inlined_call_operand.hbm [shape: f32[1,128], index: 0, kind: input, shape index: {}]   ;;  %s231_s1 = inlined_call_operand.hbm [shape: f32[1,128], index: 1, kind: input, shape index: {}]   ;;  %s232_s2 = inlined_call_operand.hbm [shape: f32[4,128], index: 2, kind: input, shape index: {}]   ;;  %s233_s3 = inlined_call_operand.hbm [shape: f32[4,128], index: 3, kind: output, shape index: {}]  }
   0x1   :  { %9 = vsyncpa [#allocation6], 0  ;;  %s27_s14 = sshll.u32 %s231_s1, 4  ;;  %s28_s14 = int_to_ptr.hbm [resolvable:$true] %s27_s14 }
   0x2   :  { %10 = vsyncpa [#allocation4], 0  ;;  %s194_s15 = smov [#allocation5]   ;;  %s16_s19 = sshll.u32 %s230_s0, 4  ;;  %s17_s19 = int_to_ptr.hbm [resolvable:$true] %s16_s19 }
   0x3   :  { %s29_s16 = sshll.u32 %s194_s15, 4  ;;  %s195_s20 = smov [#allocation2]   ;;  %s30_s16 = int_to_ptr.vmem [resolvable:$true] %s29_s16 }
   0x4   :  { %32 = dma.hbm_to_vmem [thread:$0]  %s28_s14, 16, %s30_s16, [#allocation6]  }
   0x5   :  { %s18_s21 = sshll.u32 %s195_s20, 4  ;;  %s38_s24 = sshll.u32 %s232_s2, 4  ;;  %s19_s21 = int_to_ptr.vmem [resolvable:$true] %s18_s21  ;;  %s39_s24 = int_to_ptr.hbm [resolvable:$true] %s38_s24 }
   0x6   :  { %21 = dma.hbm_to_vmem [thread:$0]  %s17_s19, 16, %s19_s21, [#allocation3]  }
   0x7   :  { %s196_s1 = smov [#allocation7]  }
   0x8   :  { %s40_s25 = sshll.u32 %s196_s1, 4  ;;  %s41_s25 = int_to_ptr.vmem [resolvable:$true] %s40_s25 }
   0x9   :  { %43 = dma.hbm_to_vmem [thread:$0]  %s39_s24, 64, %s41_s25, [#allocation6]  }
   0xa   :  { %188 = dma.done.wait [#allocation3], 16  }
   0xb   :  { %189 = vsyncadd [#allocation3], 4294967280 }
   0xc   :  { %190 = dma.done.wait [#allocation6], 80  }
   0xd   :  { %191 = vsyncadd [#allocation6], 4294967216  ;;  %v56_v0 = vld [vmem:[#allocation7] sm:$0xf]  ;;  %v90_v1 = vld [vmem:[#allocation2] ss:$0 sm:$0xff] }
   0xe   :  { %v91_v2 = vld [vmem:[#allocation5] ss:$0 sm:$0xff]  ;;  %s197_s0 = smov [#allocation8]   ;;  %s75_s2 = sshll.u32 %s233_s3, 4  ;;  %v61_v3 = vmul.f32 %v90_v1, %v56_v0  ;;  %s76_s2 = int_to_ptr.hbm [resolvable:$true] %s75_s2 }
   0xf   :  { %s73_s26 = sshll.u32 %s197_s0, 4  ;;  %s74_s26 = int_to_ptr.vmem [resolvable:$true] %s73_s26 }
  0x10   :  { %v66_v4 = vadd.f32 %v91_v2, %v61_v3 }
  0x12   :  { %67 = vst [vmem:[#allocation8] sm:$0xf] %v66_v4 }
  0x13   :  { %78 = dma.vmem_to_hbm [thread:$0]  %s74_s26, 64, %s76_s2, [#allocation4]  }
  0x14   :  { %192 = dma.done.wait [#allocation4], 64  }
  0x15   :  { %193 = vsyncadd [#allocation4], 4294967232 }
  0x16   :  { %83 = vsyncpa [#allocation3], 1 }
  0x17   :  { %84 = vsyncpa [#allocation6], 1 }
  0x18   :  { %85 = vsyncpa [#allocation4], 1 }

</bundles_post_ra>
